<compile_context>
chip_gen: v7x
topology: tpu7x:2x2x1
jax: 0.10.0
libtpu: 0.0.40
codegen_flags: <defaults>
</compile_context>

<pallas_src>
import functools

import jax
import jax.numpy as jnp
from jax.experimental import pallas as pl
from jax.experimental.pallas import tpu as pltpu


def _channel_attention_kernel(x_ref, w1t_ref, w2t_ref, o_ref, *, inv_hw):
    # x_ref  : (Nb, C, HW) VMEM  -- lane-dense batch block (HW on the lane axis)
    # w1t_ref: (C, Cr)     VMEM  -- fc1 weight, pre-transposed in the wrapper
    # w2t_ref: (Cr, C)     VMEM  -- fc2 weight, pre-transposed in the wrapper
    # o_ref  : (Nb, 1, C)  VMEM  -- sigmoid(fc2(relu(fc1(avg)) + relu(fc1(max))))
    x = x_ref[...].astype(jnp.float32)                    # (Nb, C, HW)

    # Global average / max pooling over the lane-dense spatial axis.
    avg = jnp.sum(x, axis=-1) * jnp.float32(inv_hw)       # (Nb, C)
    mx = jnp.max(x, axis=-1)                              # (Nb, C)

    w1t = w1t_ref[...]                                    # (C, Cr)
    w2t = w2t_ref[...]                                    # (Cr, C)

    # Shared MLP (1x1 convs == matmuls on pooled vectors). fc2 is linear and
    # bias-free, so apply it once to the sum of the two relu'd hidden vectors.
    h = (jnp.maximum(jnp.dot(avg, w1t, preferred_element_type=jnp.float32), 0.0)
         + jnp.maximum(jnp.dot(mx, w1t, preferred_element_type=jnp.float32), 0.0))
    y = jnp.dot(h, w2t, preferred_element_type=jnp.float32)   # (Nb, C)

    o_ref[...] = jax.nn.sigmoid(y)[:, None, :].astype(o_ref.dtype)


def channel_attention(x, fc1_weight, fc2_weight, *, block_n=None):
    """ChannelAttention forward.

    x          : (N, C, H, W)       float32 or bfloat16
    fc1_weight : (C//ratio, C, 1, 1) Conv2d(C, C//r, 1, bias=False) weight
    fc2_weight : (C, C//ratio, 1, 1) Conv2d(C//r, C, 1, bias=False) weight
    returns    : (N, C, 1, 1) attention map, same dtype as x.
    """
    N, C, H, W = x.shape
    Cr = fc1_weight.shape[0]
    HW = H * W

    # Lane-dense layout: flatten spatial dims (free reshape on contiguous NCHW).
    x_flat = x.reshape(N, C, HW)
    # Pre-transpose the tiny weights in the wrapper (layout plumbing, not compute).
    w1t = fc1_weight.reshape(Cr, C).T.astype(jnp.float32)   # (C, Cr)
    w2t = fc2_weight.reshape(C, Cr).T.astype(jnp.float32)   # (Cr, C)

    if block_n is None:
        # Target ~1 MiB of input per grid step, but keep >= 2 parallel steps
        # whenever N >= 2 so v7x's two TensorCores both get work.
        bytes_per_image = C * HW * x_flat.dtype.itemsize
        want = max(1, (1 << 20) // max(bytes_per_image, 1))
        block_n = min(want, max(N // 2, 1))
    block_n = max(1, min(block_n, N))
    while N % block_n != 0:          # keep the grid exact (no ragged last block)
        block_n -= 1
    grid_n = N // block_n

    kernel = functools.partial(_channel_attention_kernel, inv_hw=1.0 / HW)

    out = pl.pallas_call(
        kernel,
        out_shape=jax.ShapeDtypeStruct((N, 1, C), x.dtype),
        grid=(grid_n,),
        in_specs=[
            # (Nb, C, HW): last two dims are (full C, HW multiple of 128).
            pl.BlockSpec((block_n, C, HW), lambda i: (i, 0, 0)),
            # Tiny weights: full-array blocks, same block every step.
            pl.BlockSpec((C, Cr), lambda i: (0, 0)),
            pl.BlockSpec((Cr, C), lambda i: (0, 0)),
        ],
        out_specs=pl.BlockSpec((block_n, 1, C), lambda i: (i, 0, 0)),
        compiler_params=pltpu.CompilerParams(
            dimension_semantics=("parallel",)),
    )(x_flat, w1t, w2t)

    return out.reshape(N, C, 1, 1)


def _reference(x, fc1_weight, fc2_weight):
    """Plain-JAX reference matching the PyTorch ChannelAttention forward."""
    N, C, H, W = x.shape
    Cr = fc1_weight.shape[0]
    w1 = fc1_weight.reshape(Cr, C)
    w2 = fc2_weight.reshape(C, Cr)
    avg = jnp.mean(x, axis=(2, 3))          # (N, C)
    mx = jnp.max(x, axis=(2, 3))            # (N, C)

    def mlp(p):
        return jnp.maximum(p @ w1.T, 0.0) @ w2.T

    y = jax.nn.sigmoid(mlp(avg) + mlp(mx))  # (N, C)
    return y[:, :, None, None]


if __name__ == "__main__":
    key = jax.random.PRNGKey(0)
    kx, k1, k2 = jax.random.split(key, 3)

    N, C, H, W = 2, 4, 16, 16
    ratio = 4
    Cr = C // ratio

    x = jax.random.normal(kx, (N, C, H, W), dtype=jnp.float32)
    # Deterministic synthetic weights with nn.Conv2d(.., 1, bias=False) shapes.
    fc1_weight = 0.1 * jax.random.normal(k1, (Cr, C, 1, 1), dtype=jnp.float32)
    fc2_weight = 0.1 * jax.random.normal(k2, (C, Cr, 1, 1), dtype=jnp.float32)

    out = channel_attention(x, fc1_weight, fc2_weight)
    out = jax.block_until_ready(out)

    ref = _reference(x, fc1_weight, fc2_weight)
    assert out.shape == (N, C, 1, 1)
    assert jnp.allclose(out, ref, atol=1e-5, rtol=1e-5), "mismatch vs reference"

    print("KERNEL_OK")
</pallas_src>

<mosaic_0001>
module attributes {stable_mosaic.version = 11 : i64} {
  func.func @_channel_attention_kernel(%arg0: i32, %arg1: memref<1x4x256xf32, #tpu.memory_space<vmem>>, %arg2: memref<4x1xf32, #tpu.memory_space<vmem>>, %arg3: memref<1x4xf32, #tpu.memory_space<vmem>>, %arg4: memref<1x1x4xf32, #tpu.memory_space<vmem>>) attributes {dimension_semantics = [#tpu.dimension_semantics<parallel>], iteration_bounds = array<i64: 2>, scalar_prefetch = 0 : i64, scratch_operands = 0 : i64, tpu.core_type = #tpu.core_type<tc>, window_params = [{transform_indices = @transform_0, window_bounds = array<i64: 1, 4, 256>}, {pipeline_mode = #tpu.pipeline_mode<synchronous>, transform_indices = @transform_1, window_bounds = array<i64: 4, 1>}, {pipeline_mode = #tpu.pipeline_mode<synchronous>, transform_indices = @transform_2, window_bounds = array<i64: 1, 4>}, {transform_indices = @transform_3, window_bounds = array<i64: 1, 1, 4>}]} {
    %c0 = arith.constant 0 : index
    %c0_0 = arith.constant 0 : index
    %c0_1 = arith.constant 0 : index
    %0 = vector.load %arg1[%c0, %c0_0, %c0_1] : memref<1x4x256xf32, #tpu.memory_space<vmem>>, vector<1x4x256xf32>
    %cst = arith.constant dense<0.000000e+00> : vector<1x4xf32>
    %1 = vector.multi_reduction <add>, %0, %cst [2] : vector<1x4x256xf32> to vector<1x4xf32>
    %cst_2 = arith.constant 3.906250e-03 : f32
    %2 = vector.broadcast %cst_2 : f32 to vector<1x4xf32>
    %3 = arith.mulf %1, %2 : vector<1x4xf32>
    %cst_3 = arith.constant dense<0xFF800000> : vector<1x4xf32>
    %4 = vector.multi_reduction <maximumf>, %0, %cst_3 [2] : vector<1x4x256xf32> to vector<1x4xf32>
    %c0_4 = arith.constant 0 : index
    %c0_5 = arith.constant 0 : index
    %5 = vector.load %arg2[%c0_4, %c0_5] : memref<4x1xf32, #tpu.memory_space<vmem>>, vector<4x1xf32>
    %c0_6 = arith.constant 0 : index
    %c0_7 = arith.constant 0 : index
    %6 = vector.load %arg3[%c0_6, %c0_7] : memref<1x4xf32, #tpu.memory_space<vmem>>, vector<1x4xf32>
    %cst_8 = arith.constant dense<0.000000e+00> : vector<1x1xf32>
    %7 = tpu.matmul %3, %5, %cst_8 {dimension_numbers = #tpu.dot_dimension_numbers<[1], [0], [0], [1], [0, 0, 1, 1], [], []>} : vector<1x4xf32>, vector<4x1xf32>, vector<1x1xf32> -> vector<1x1xf32>
    %cst_9 = arith.constant 0.000000e+00 : f32
    %8 = vector.broadcast %cst_9 : f32 to vector<1x1xf32>
    %9 = arith.maximumf %7, %8 : vector<1x1xf32>
    %cst_10 = arith.constant dense<0.000000e+00> : vector<1x1xf32>
    %10 = tpu.matmul %4, %5, %cst_10 {dimension_numbers = #tpu.dot_dimension_numbers<[1], [0], [0], [1], [0, 0, 1, 1], [], []>} : vector<1x4xf32>, vector<4x1xf32>, vector<1x1xf32> -> vector<1x1xf32>
    %cst_11 = arith.constant 0.000000e+00 : f32
    %11 = vector.broadcast %cst_11 : f32 to vector<1x1xf32>
    %12 = arith.maximumf %10, %11 : vector<1x1xf32>
    %13 = arith.addf %9, %12 : vector<1x1xf32>
    %cst_12 = arith.constant dense<0.000000e+00> : vector<1x4xf32>
    %14 = tpu.matmul %13, %6, %cst_12 {dimension_numbers = #tpu.dot_dimension_numbers<[1], [0], [0], [1], [0, 0, 1, 1], [], []>} : vector<1x1xf32>, vector<1x4xf32>, vector<1x4xf32> -> vector<1x4xf32>
    %15 = arith.negf %14 : vector<1x4xf32>
    %16 = math.exp %15 : vector<1x4xf32>
    %cst_13 = arith.constant 1.000000e+00 : f32
    %17 = vector.broadcast %cst_13 : f32 to vector<1x4xf32>
    %18 = arith.addf %17, %16 : vector<1x4xf32>
    %19 = arith.divf %17, %18 : vector<1x4xf32>
    %20 = vector.shape_cast %19 : vector<1x4xf32> to vector<1x1x4xf32>
    %c0_14 = arith.constant 0 : index
    %c0_15 = arith.constant 0 : index
    %c0_16 = arith.constant 0 : index
    %21 = vector.load %arg4[%c0_14, %c0_15, %c0_16] : memref<1x1x4xf32, #tpu.memory_space<vmem>>, vector<1x1x4xf32>
    tpu.vector_store %arg4[%c0_14, %c0_15, %c0_16], %20 {strides = array<i32>} : memref<1x1x4xf32, #tpu.memory_space<vmem>>, vector<1x1x4xf32>,
    return
  }
  func.func @transform_0(%arg0: i32) -> (i32, i32, i32) {
    %c0_i32 = arith.constant 0 : i32
    %c0_i32_0 = arith.constant 0 : i32
    %c0_i32_1 = arith.constant 0 : i32
    return %arg0, %c0_i32, %c0_i32_0 : i32, i32, i32
  }
  func.func @transform_1(%arg0: i32) -> (i32, i32) {
    %c0_i32 = arith.constant 0 : i32
    %c0_i32_0 = arith.constant 0 : i32
    %c0_i32_1 = arith.constant 0 : i32
    return %c0_i32, %c0_i32_0 : i32, i32
  }
  func.func @transform_2(%arg0: i32) -> (i32, i32) {
    %c0_i32 = arith.constant 0 : i32
    %c0_i32_0 = arith.constant 0 : i32
    %c0_i32_1 = arith.constant 0 : i32
    return %c0_i32, %c0_i32_0 : i32, i32
  }
  func.func @transform_3(%arg0: i32) -> (i32, i32, i32) {
    %c0_i32 = arith.constant 0 : i32
    %c0_i32_0 = arith.constant 0 : i32
    %c0_i32_1 = arith.constant 0 : i32
    return %arg0, %c0_i32, %c0_i32_0 : i32, i32, i32
  }
}

</mosaic_0001>

<bundles_post_ra>
// kernel: tpu_custom_call.1
= control target key start
LH: loop header
LB: loop body
LE: loop exit
PB: predicated region body
PF: predicated region fallthrough
CT: control target
= control target key end

     0   :  { %8 = vsyncpa [#allocation3], 0  ;;  %s924_s0 = inlined_call_operand.hbm [shape: f32[2,4,256], index: 0, kind: input, shape index: {}]   ;;  %s925_s1 = inlined_call_operand.vmem [shape: f32[4,1], index: 1, kind: input, shape index: {}]   ;;  %s926_s2 = inlined_call_operand.vmem [shape: f32[1,4], index: 2, kind: input, shape index: {}]   ;;  %s927_s3 = inlined_call_operand.hbm [shape: f32[2,1,4], index: 3, kind: output, shape index: {}]  }
   0x1   :  { %10 = vsyncpa [#allocation3 + $0x1], 0 }
   0x2   :  { %11 = vsyncpa [#allocation4], 0 }
   0x3   :  { %13 = vsyncpa [#allocation4 + $0x1], 0  ;;  %s747_s12 = smov 0   ;;  %s749_s13 = smov 0  }
   0x4   :  { %s751_s14 = smov 0   ;;  %s753_s15 = smov 0  }
   0x5 LB: > { %s768_s16 = sadd.s32 4294967295, %s721_s15   ;;  %s532_s17 = sadd.s32 4294967294, %s721_s15   ;;  %s721_s15 = sphi %s753_s15, %s942_s15   ;;  %s717_s14 = sphi %s751_s14, %s941_s14   ;;  %s713_s13 = sphi %s749_s13, %s940_s13   ;;  %s709_s12 = sphi %s747_s12, %s939_s12  }
   0x6   : > { %s772_s18 = sadd.s32 1, %s721_s15   ;;  %s26_s19 = sadd.s32 1, %s717_s14 }
   0x7   : > { %s23_s20 = ssub.s32 %s721_s15, %s772_s18  ;;  %p33_p0 = scmp.ne.s32.totalorder %s717_s14, %s713_s13 }
   0x8   : > { %p24_p1 = scmp.eq.s32.totalorder %s23_s20, 0  ;;  %p34_p2 = scmp.eq.s32.totalorder %s721_s15, 0 }
   0x9   : > { %p39_p3 = scmp.ne.s32.totalorder %s713_s13, %s709_s12  ;;  %p40_p4 = scmp.eq.s32.totalorder %s768_s16, 0 }
   0xa   : > { %s784_s21 = scalar_select %p24_p1, %s717_s14, %s26_s19  }
   0xb   : > { %p786_p5 = por %p34_p2, %p33_p0  ;;  %p790_p6 = por %p40_p4, %p39_p3 }
   0xc   : > { %p105_p7 = scmp.eq.s32.totalorder %s768_s16, 1  ;;  %p111_p8 = scmp.eq.s32.totalorder %s532_s17, 1 }
   0xd   : > { %p584_p10 = scmp.lt.s32.totalorder %s721_s15, 2  ;;  %s137_s26 = sand.u32 1, %s717_s14  }
   0xe   : > { %p797_p11 = por %p105_p7, %p33_p0  ;;  %p801_p12 = por %p111_p8, %p39_p3 }
   0xf   : > { %s550_s27 = sshll.u32 %s721_s15, 7  ;;  %s535_s28 = sshll.u32 %s137_s26, 3 }
  0x10   : > { %s931_s24 = scalar_select %p797_p11, 1, 0 }
  0x11   : > { %s932_s25 = scalar_select %p801_p12, 1, 0 }
  0x12   : > { %s810_s4 = scalar_lea.hbm %s924_s0, %s550_s27  ;;  %s141_s5 = scalar_lea.vmem [#allocation2], %s535_s28 }
  0x13   : > { %s149_s6 = sshll.u32 %s141_s5, 4  ;;  %p814_p13 = pnand %p584_p10, %p786_p5  ;;  %s818_s6 = int_to_ptr.vmem [resolvable:$true] %s149_s6 }
  0x14   : > { %s138_s8 = scalar_lea.sflag [#allocation3], %s137_s26  ;;  %s625_s9 = scalar_lea.hbm %s810_s4, 128 }
  0x15   : > { %p626_p2 = scmp.ne.s32.totalorder %s810_s4, %s625_s9  ;;  %p627_p3 = pneg %p814_p13 }
  0x16   : > { %s630_s17 = scalar_lea.hbm %s924_s0, 256  ;;  %p631_p5 = scmp.lt.u32.totalorder %s810_s4, %s924_s0 }
  0x17   : > { %p628_p4 = pnand %p627_p3, %p626_p2  ;;  %p632_p8 = scmp.lt.u32.totalorder %s630_s17, %s625_s9 }
  0x18   : > { %p634_p9 = scmp.lt.u32.totalorder %s625_s9, %s810_s4 }
  0x19   : > { %p629_p7 = pneg %p628_p4  ;;  %p633_p10 = por %p632_p8, %p631_p5 }
  0x1b   : > { %p635_p0 = por %p634_p9, %p633_p10 }
  0x1d   : > { %p636_p1 = pnand %p635_p0, %p629_p7 }
  0x1f   : > { %639 = shalt.err (!%p636_p1)
}
  0x20   : > { %s640_s22 = scalar_lea.vmem %s818_s6, 128  ;;  %s723_s26 = smov [#allocation2]  }
  0x21   : > { %p641_p2 = scmp.ne.s32.totalorder %s818_s6, %s640_s22  ;;  %s645_s27 = sshll.u32 %s723_s26, 4  ;;  %s646_s27 = int_to_ptr.vmem [resolvable:$false] %s645_s27 }
  0x22   : > { %s647_s28 = scalar_lea.vmem %s646_s27, 256  ;;  %p648_p11 = scmp.lt.s32.totalorder %s818_s6, %s646_s27 }
  0x23   : > { %p643_p4 = pnand %p641_p2, %p627_p3  ;;  %p649_p5 = scmp.lt.s32.totalorder %s647_s28, %s640_s22 }
  0x25   : > { %p644_p12 = pneg %p643_p4  ;;  %p650_p8 = por %p649_p5, %p648_p11 }
  0x27   : > { %p651_p9 = pnand %p650_p8, %p644_p12 }
  0x29   : > { %654 = shalt.err (!%p651_p9)
}
  0x2a   : > { %579 = dma.hbm_to_vmem [thread:$0]  (!%p814_p13), %s810_s4, 128, %s818_s6, %s138_s8  }
  0x2b   : > { %p934_p0 = scmp.lt.s32.totalorder %s721_s15, 3  ;;  %p935_p1 = scmp.ge.s32.totalorder %s721_s15, 1 }
  0x2d   : > { %p155_p3 = pnand %p935_p1, %p934_p0 }
  0x2e   : > { %s852_s29 = sand.u32 (!%p155_p3), 1, %s713_s13  }
  0x2f   : > { %158 = sbr.rel (%p155_p3) target bundleno = 677 (0x2a5), region = 32  ;;  %s539_s30 = sshll.u32 (!%p155_p3), %s852_s29, 3 }
  0x30   : > { %s161_s5 = scalar_lea.sflag (!%p155_p3), [#allocation3], %s852_s29  ;;  %s164_s9 = scalar_lea.vmem (!%p155_p3), [#allocation2], %s539_s30 }
  0x36   : > { %700 = dma.done.wait (%p790_p6), %s161_s5, 128  }
  0x37   : > { %702 = vsyncadd (%p790_p6), %s161_s5, 4294967168  ;;  %vm190_vm0 = vcmask 1043456   ;;  %v186_v0 = vld [vmem:[%s164_s9] sm:$0xff]  ;;  %v724_v8 = vmov 0.0   ;;  %vm725_vm1 = vmmov 0   ;;  %v205_v10 = vlaneseq  ;;  %s547_s8 = sshll.u32 %s768_s16, 4 }
  0x38   : > { %v188_v1 = vcombine.high %v186_v0, %v186_v0  ;;  %v191_v2 = vsel %vm190_vm0, %v186_v0, 0.0  ;;  %v197_v4 = vsel %vm190_vm0, %v186_v0, -inf  ;;  %557 = vmatprep.subr.mxu0 %v724_v8  ;;  %v202_v9 = vld [vmem:[%s925_s1] sm:$0xf]  ;;  %562 = vmatprep.subr.mxu1 %v724_v8  ;;  %vm211_vm2 = vcmask 31744   ;;  %s185_s10 = scalar_lea.vmem [#allocation5], %s852_s29  ;;  %s880_s20 = scalar_lea.hbm %s927_s3, %s547_s8 }
  0x39   : > { %558 = vmatpush3.msk.msra.mxu0 %vm190_vm0, %v202_v9  ;;  %559 = vmatprep.mubr.msk.f32.mxu0 %vm725_vm1, %v724_v8  ;;  %v206_v11 = vand.u32 127, %v205_v10  ;;  %v208_v12 = vshrl.u32 %v205_v10, 7  ;;  %v203_v19 = vld [vmem:[%s926_s2] sm:$0x1]  ;;  %vm371_vm3 = vcmask 1040384   ;;  %vm367_vm4 = vcmask 7168  }
  0x3a   : > { %v192_v3 = vsel %vm190_vm0, %v188_v1, 0.0  ;;  %v198_v5 = vsel %vm190_vm0, %v188_v1, -inf  ;;  %563 = vmatpush3.msk.msra.mxu1 %vm190_vm0, %v202_v9  ;;  %564 = vmatprep.mubr.msk.f32.mxu1 %vm725_vm1, %v724_v8  ;;  %s466_s11 = sshll.u32 %s185_s10, 4  ;;  %vm451_vm5 = vcmask 24576   ;;  %s454_s22 = scalar_lea.sflag [#allocation4], %s852_s29  ;;  %s882_s11 = int_to_ptr.vmem [resolvable:$true] %s466_s11 }
  0x3b   : > { %v193_v6 = vadd.f32 %v192_v3, %v191_v2  ;;  %v199_v7 = vmax.f32 %v197_v4, %v198_v5  ;;  %567 = vmatprep.subr.mxu0 %v724_v8  ;;  %v209_v13 = vsub.s32 %v206_v11, %v208_v12  ;;  %s655_s26 = scalar_lea.vmem %s882_s11, 16  ;;  %p936_p11 = scmp.ne.s32.totalorder %s931_s24, 0 }
  0x3c   : > { %p656_p6 = scmp.ne.s32.totalorder %s882_s11, %s655_s26  ;;  %s726_s16 = smov [#allocation5]  }
  0x3d   : > { %194 = vadd.xlane.f32.xlu0 %v193_v6  ;;  %s659_s27 = sshll.u32 %s726_s16, 4  ;;  %s660_s27 = int_to_ptr.vmem [resolvable:$false] %s659_s27 }
  0x3e   : > { %p657_p12 = pnand %p656_p6, %p936_p11  ;;  %s661_s28 = scalar_lea.vmem %s660_s27, 32 }
  0x3f   : > { %p662_p7 = scmp.lt.s32.totalorder %s882_s11, %s660_s27  ;;  %p663_p10 = scmp.lt.s32.totalorder %s661_s28, %s655_s26 }
  0x40   : > { %p658_p13 = pneg %p657_p12 }
  0x41   : > { %200 = vmax.xlane.f32.xlu0 %v199_v7  ;;  %p664_p2 = por %p663_p10, %p662_p7 }
  0x43   : > { %p665_p4 = pnand %p664_p2, %p658_p13 }
  0xca   : > { %v195_v14 = vpop.xlane.xlu0 %194 }
  0xcb   : > { %v196_v15 = vmul.f32 0.00390625, %v195_v14 }
  0xcd   : > { %v210_v16 = vrot.slane %v196_v15, %v209_v13 }
  0xce   : > { %v201_v17 = vpop.xlane.xlu0 %200 }
  0xcf   : > { %v292_v18 = vrot.slane %v201_v17, %v209_v13  ;;  %560 = vmatmul.mubr.msk.f32.vlgmr.msra.gmra.mrb[0].mxu0 %vm211_vm2, %v210_v16 }
  0xd0   : > { %569 = vmatprep.mubr.msk.f32.mxu0 %vm725_vm1, %v724_v8  ;;  %568 = vmatpush3.msk.msra.mxu0 %vm371_vm3, %v203_v19 }
  0xd1   : > { %565 = vmatmul.mubr.msk.f32.vlgmr.msra.gmra.mrb[0].mxu1 %vm211_vm2, %v292_v18 }
 0x1a2   : > { %v283_v20 = vpop.f32.mrb[0].mxu0 }
 0x1a3   : > { %v561_v21 = vpop.f32.mrb[1].mxu0  ;;  %v287_v23 = vmax.f32 %v283_v20, 0.0 }
 0x1a4   : > { %v361_v22 = vpop.f32.mrb[0].mxu1 }
 0x1a5   : > { %v365_v24 = vmax.f32 %v361_v22, 0.0  ;;  %v566_v25 = vpop.f32.mrb[1].mxu1 }
 0x1a7   : > { %v366_v26 = vadd.f32 %v365_v24, %v287_v23 }
 0x1a9   : > { %570 = vmatmul.mubr.msk.f32.vlgmr.msra.gmra.mrb[2].mxu0 %vm367_vm4, %v366_v26 }
 0x27c   : > { %v441_v27 = vpop.f32.mrb[2].mxu0 }
 0x27d   : > { %v546_v28 = vmul.f32 -1.442695, %v441_v27  ;;  %v571_v29 = vpop.f32.mrb[3].mxu0 }
 0x27f   : > { %621 = vpow2.f32 %v546_v28 }
 0x289   : > { %v622_v30 = vpop.eup %621 }
 0x28a   : > { %v448_v31 = vadd.f32 1.0, %v622_v30 }
 0x28c   : > { %623 = vrcp.f32 %v448_v31 }
 0x296   : > { %v624_v32 = vpop.eup %623 }
 0x297   : > { %452 = vst.msk [vmem:[%s185_s10] sm:$0x1] %vm451_vm5, %v624_v32 }
 0x298   : > { %668 = shalt.err (!%p665_p4)
}
 0x299   : > { %s669_s29 = scalar_lea.hbm %s880_s20, 16  ;;  %s673_s9 = scalar_lea.hbm %s927_s3, 32 }
 0x29a   : > { %p670_p5 = scmp.ne.s32.totalorder %s880_s20, %s669_s29  ;;  %p674_p0 = scmp.lt.u32.totalorder %s880_s20, %s927_s3 }
 0x29b   : > { %p675_p1 = scmp.lt.u32.totalorder %s673_s9, %s669_s29  ;;  %p677_p6 = scmp.lt.u32.totalorder %s669_s29, %s880_s20 }
 0x29c   : > { %p671_p8 = pnand %p670_p5, %p936_p11 }
 0x29d   : > { %p676_p3 = por %p675_p1, %p674_p0 }
 0x29e   : > { %p672_p9 = pneg %p671_p8 }
 0x29f   : > { %p678_p12 = por %p677_p6, %p676_p3 }
 0x2a1   : > { %p679_p13 = pnand %p678_p12, %p672_p9 }
 0x2a3   : > { %682 = shalt.err (!%p679_p13)
}
 0x2a4   : > { %574 = dma.vmem_to_hbm [thread:$0]  (%p936_p11), %s882_s11, 16, %s880_s20, %s454_s22  }
 0x2a5 PF: > { %s478_s6 = sand.u32 1, %s709_s12   ;;  %p937_p7 = scmp.ne.s32.totalorder %s932_s25, 0 }
 0x2a6   : > { %p938_p10 = scmp.ge.s32.totalorder %s721_s15, 2  ;;  %s479_s7 = scalar_lea.sflag [#allocation4], %s478_s6 }
 0x2a8   : > { %p581_p2 = pnand %p938_p10, %p937_p7 }
 0x2aa   : > { %704 = dma.done.wait (!%p581_p2), %s479_s7, 16  }
 0x2ab   : > { %706 = vsyncadd (!%p581_p2), %s479_s7, 4294967280  ;;  %p16_p4 = scmp.ge.s32.totalorder %s772_s18, 4   ;;  %s939_s12 = smov %s713_s13 }
 0x2ac   : > { %s940_s13 = smov %s717_s14  ;;  %s941_s14 = smov %s784_s21 }
 0x2ad   : > { %s942_s15 = smov %s772_s18  ;;  %18 = sbr.rel (!%p16_p4) target bundleno = 5 (0x5), region = 77 }
 0x2b4   :  { %483 = vsyncpa [#allocation3], 1 }
 0x2b5   :  { %485 = vsyncpa [#allocation3 + $0x1], 1 }
 0x2b6   :  { %486 = vsyncpa [#allocation4], 1 }
 0x2b7   :  { %488 = vsyncpa [#allocation4 + $0x1], 1 }

</bundles_post_ra>
